<compile_context>
chip_gen: v7x
topology: tpu7x:2x2x1
jax: 0.10.0
libtpu: 0.0.40
codegen_flags: <defaults>
</compile_context>

<pallas_src>
import functools

import jax
import jax.numpy as jnp
from jax.experimental import pallas as pl
from jax.experimental.pallas import tpu as pltpu


_BN_EPS = 1e-5


def _round_up(x, m):
    return ((x + m - 1) // m) * m


# ---------------------------------------------------------------------------
# Shared per-tile epilogue: BN (from raw sums) + ReLU + 1x1 conv + sigmoid,
# producing the transposed (KP8, TM) block (M lane-dense).
# ---------------------------------------------------------------------------
def _bn_relu_conv2_sigmoid(h, s1, s2, g, bt, w2, b2, inv_m):
    # h: (TM, Hdp) f32; s1,s2,g,bt: (1, Hdp) f32; w2: (KP8, Hdp) bf16; b2: (KP8,1) f32
    mean = s1 * inv_m
    var = jnp.maximum(s2 * inv_m - mean * mean, 0.0)      # biased (training) var
    scale = g * jax.lax.rsqrt(var + _BN_EPS)
    shift = bt - mean * scale
    hn = jnp.maximum(h * scale + shift, 0.0)              # fused BN + ReLU
    # out^T = W2 @ hn^T: contract Hd (dim 1 of both) so the tiny object dim
    # (KP8 = 8 sublanes) is on sublanes and M stays lane-dense.
    o = jax.lax.dot_general(
        w2, hn.astype(jnp.bfloat16),
        dimension_numbers=(((1,), (1,)), ((), ())),
        preferred_element_type=jnp.float32) + b2
    return jax.nn.sigmoid(o)                              # (KP8, TM) f32


# ---------------------------------------------------------------------------
# MAIN PATH: fused two-phase kernel, h resident in VMEM scratch.
# ---------------------------------------------------------------------------
def _fused_kernel(xp_ref, w1_ref, g_ref, bt_ref, w2_ref, b2_ref, out_ref,
                  h_scr, s1_scr, s2_scr, *, tm, inv_m):
    p = pl.program_id(0)     # phase: 0 = conv1 + stats, 1 = BN/ReLU/conv2/sigmoid
    i = pl.program_id(1)     # M tile
    row0 = pl.multiple_of(i * tm, tm)

    @pl.when(jnp.logical_and(p == 0, i == 0))
    def _init():
        s1_scr[...] = jnp.zeros_like(s1_scr)
        s2_scr[...] = jnp.zeros_like(s2_scr)

    @pl.when(p == 0)
    def _phase0():
        h32 = jnp.dot(xp_ref[...], w1_ref[...],
                      preferred_element_type=jnp.float32)     # (TM, Hdp)
        h_scr[pl.ds(row0, tm), :] = h32                       # stays in VMEM
        # BN partial sums straight from the f32 accumulator (no bf16 round trip).
        s1_scr[...] += jnp.sum(h32, axis=0, keepdims=True)
        s2_scr[...] += jnp.sum(h32 * h32, axis=0, keepdims=True)

    @pl.when(p == 1)
    def _phase1():
        h = h_scr[pl.ds(row0, tm), :]
        out_ref[...] = _bn_relu_conv2_sigmoid(
            h, s1_scr[...], s2_scr[...], g_ref[...], bt_ref[...],
            w2_ref[...], b2_ref[...], inv_m)


# ---------------------------------------------------------------------------
# FALLBACK PATH (large M): two pipelined calls, h round-trips HBM as bf16.
# ---------------------------------------------------------------------------
def _pass1_kernel(xp_ref, w1_ref, h_ref, st_ref):
    h32 = jnp.dot(xp_ref[...], w1_ref[...], preferred_element_type=jnp.float32)
    h_ref[...] = h32.astype(jnp.bfloat16)
    # Two slice stores (no concat relayout), stats from the f32 accumulator.
    st_ref[0, 0:1, :] = jnp.sum(h32, axis=0, keepdims=True)
    st_ref[0, 1:2, :] = jnp.sum(h32 * h32, axis=0, keepdims=True)


def _pass2_kernel(h_ref, st_ref, g_ref, bt_ref, w2_ref, b2_ref, out_ref, *, inv_m):
    out_ref[...] = _bn_relu_conv2_sigmoid(
        h_ref[...].astype(jnp.float32), st_ref[0:1, :], st_ref[1:2, :],
        g_ref[...], bt_ref[...], w2_ref[...], b2_ref[...], inv_m)


# ---------------------------------------------------------------------------
# Wrapper
# ---------------------------------------------------------------------------
def encoder_cnn_small(obs, w1, b1, gamma, beta, w2, b2, *, tile_m=1024):
    """Forward pass of EncoderCNNSmall (training-mode BatchNorm).

    obs: (N, C, H, W) f32;  w1: (Hd, C, 10, 10), b1: (Hd,)
    gamma/beta: (Hd,);      w2: (K, Hd, 1, 1), b2: (K,)
    returns (N, K, H//10, W//10) f32
    """
    del b1  # cancelled exactly by the training-mode BatchNorm that follows cnn1

    N, C, H, W = obs.shape
    Ho, Wo = H // 10, W // 10
    Hd = w1.shape[0]
    K = w2.shape[0]

    M = N * Ho * Wo
    K1 = C * 100

    K1p = _round_up(K1, 128)            # lane pad for the patch matmul K dim
    Hdp = _round_up(Hd, 128)            # lane pad for hidden dim
    KP8 = _round_up(K, 8)               # sublane pad for the (transposed) output

    # Balanced M tiles (multiple of 128 -> lane-dense transposed output blocks,
    # tile-aligned h-scratch offsets).  ~1024 rows/tile keeps per-grid-step
    # overhead negligible; for large M the fallback path gets >= 2 "parallel"
    # tiles, so v7x megacore sharding applies there.
    m128 = _round_up(M, 128)
    n_tiles = max(1, -(-m128 // tile_m))
    TM = _round_up(-(-m128 // n_tiles), 128)
    Mp = TM * n_tiles

    # --- glue: im2col of 10x10 stride-10 patches (bf16, zero padded) --------
    x = obs[:, :, :Ho * 10, :Wo * 10].astype(jnp.bfloat16)
    xp = x.reshape(N, C, Ho, 10, Wo, 10)
    xp = jnp.transpose(xp, (0, 2, 4, 1, 3, 5)).reshape(M, K1)
    xp = jnp.pad(xp, ((0, Mp - M), (0, K1p - K1)))

    # --- glue: parameter packing (bf16 MXU operands, f32 BN params) ---------
    w1m = jnp.pad(w1.reshape(Hd, K1).T,
                  ((0, K1p - K1), (0, Hdp - Hd))).astype(jnp.bfloat16)   # (K1p, Hdp)
    w2t = jnp.pad(w2.reshape(K, Hd),
                  ((0, KP8 - K), (0, Hdp - Hd))).astype(jnp.bfloat16)    # (KP8, Hdp)
    b2t = jnp.pad(b2, (0, KP8 - K)).reshape(KP8, 1).astype(jnp.float32)  # (KP8, 1)
    g2 = jnp.pad(gamma, (0, Hdp - Hd)).reshape(1, Hdp).astype(jnp.float32)
    bt2 = jnp.pad(beta, (0, Hdp - Hd)).reshape(1, Hdp).astype(jnp.float32)

    inv_m = 1.0 / M   # zero-padded rows contribute exactly 0 to the sums

    # VMEM working-set estimate for the fused (h-resident-in-VMEM) path.
    fused_vmem = (Mp * Hdp * 4            # f32 h scratch
                  + 2 * TM * K1p * 2      # double-buffered xp blocks
                  + 2 * K1p * Hdp * 2     # w1 (resident)
                  + 2 * KP8 * TM * 4      # double-buffered output blocks
                  + (1 << 20))            # misc headroom
    use_fused = fused_vmem <= 36 * 1024 * 1024   # conservative even on v7x (64 MiB)

    if use_fused:
        out_t = pl.pallas_call(
            functools.partial(_fused_kernel, tm=TM, inv_m=inv_m),
            out_shape=jax.ShapeDtypeStruct((KP8, Mp), jnp.float32),
            grid=(2, n_tiles),
            in_specs=[
                pl.BlockSpec((TM, K1p), lambda p, i: (i * (1 - p), 0)),  # patches
                pl.BlockSpec((K1p, Hdp), lambda p, i: (0, 0)),           # W1
                pl.BlockSpec((1, Hdp), lambda p, i: (0, 0)),             # gamma
                pl.BlockSpec((1, Hdp), lambda p, i: (0, 0)),             # beta
                pl.BlockSpec((KP8, Hdp), lambda p, i: (0, 0)),           # W2 (row-major)
                pl.BlockSpec((KP8, 1), lambda p, i: (0, 0)),             # b2
            ],
            out_specs=pl.BlockSpec((KP8, TM), lambda p, i: (0, i * p)),
            scratch_shapes=[
                pltpu.VMEM((Mp, Hdp), jnp.float32),   # resident h
                pltpu.VMEM((1, Hdp), jnp.float32),    # sum(h)
                pltpu.VMEM((1, Hdp), jnp.float32),    # sum(h^2)
            ],
            compiler_params=pltpu.CompilerParams(
                # Phase 1 depends on phase 0 and the stat scratch is a
                # cross-tile accumulator, so neither axis may be megacore-split.
                dimension_semantics=("arbitrary", "arbitrary"),
                vmem_limit_bytes=min(56 * 1024 * 1024,
                                     max(32 * 1024 * 1024,
                                         fused_vmem + (8 << 20))),
            ),
        )(xp, w1m, g2, bt2, w2t, b2t)
    else:
        cparams = pltpu.CompilerParams(
            dimension_semantics=("parallel",),
            vmem_limit_bytes=32 * 1024 * 1024,
        )
        h_pad, part = pl.pallas_call(
            _pass1_kernel,
            out_shape=(jax.ShapeDtypeStruct((Mp, Hdp), jnp.bfloat16),
                       jax.ShapeDtypeStruct((n_tiles, 2, Hdp), jnp.float32)),
            grid=(n_tiles,),
            in_specs=[pl.BlockSpec((TM, K1p), lambda i: (i, 0)),
                      pl.BlockSpec((K1p, Hdp), lambda i: (0, 0))],
            out_specs=(pl.BlockSpec((TM, Hdp), lambda i: (i, 0)),
                       pl.BlockSpec((1, 2, Hdp), lambda i: (i, 0, 0))),
            compiler_params=cparams,
        )(xp, w1m)

        sums = jnp.sum(part, axis=0)   # (2, Hdp) -- parameter-sized reduction

        out_t = pl.pallas_call(
            functools.partial(_pass2_kernel, inv_m=inv_m),
            out_shape=jax.ShapeDtypeStruct((KP8, Mp), jnp.float32),
            grid=(n_tiles,),
            in_specs=[pl.BlockSpec((TM, Hdp), lambda i: (i, 0)),
                      pl.BlockSpec((2, Hdp), lambda i: (0, 0)),
                      pl.BlockSpec((1, Hdp), lambda i: (0, 0)),
                      pl.BlockSpec((1, Hdp), lambda i: (0, 0)),
                      pl.BlockSpec((KP8, Hdp), lambda i: (0, 0)),
                      pl.BlockSpec((KP8, 1), lambda i: (0, 0))],
            out_specs=pl.BlockSpec((KP8, TM), lambda i: (0, i)),
            compiler_params=cparams,
        )(h_pad, sums, g2, bt2, w2t, b2t)

    out = out_t[:K, :M].reshape(K, N, Ho, Wo)
    return jnp.transpose(out, (1, 0, 2, 3))


# ---------------------------------------------------------------------------
# Pure-JAX reference (training-mode BatchNorm, biased variance).
# ---------------------------------------------------------------------------
def _reference(obs, w1, b1, gamma, beta, w2, b2):
    N, C, H, W = obs.shape
    Ho, Wo = H // 10, W // 10
    Hd, K = w1.shape[0], w2.shape[0]
    x = obs[:, :, :Ho * 10, :Wo * 10].reshape(N, C, Ho, 10, Wo, 10)
    x = jnp.transpose(x, (0, 2, 4, 1, 3, 5)).reshape(N * Ho * Wo, C * 100)
    h = x @ w1.reshape(Hd, -1).T + b1
    mean = jnp.mean(h, axis=0)
    var = jnp.mean((h - mean) ** 2, axis=0)
    hn = jnp.maximum((h - mean) * jax.lax.rsqrt(var + _BN_EPS) * gamma + beta, 0.0)
    o = jax.nn.sigmoid(hn @ w2.reshape(K, Hd).T + b2)
    return jnp.transpose(o.reshape(N, Ho, Wo, K), (0, 3, 1, 2))


if __name__ == "__main__":
    # Shapes consistent with the module: input_dim=3, hidden_dim=32,
    # num_objects=5; spatial 20x20 -> 2x2 feature map after the stride-10 conv.
    N, C, H, W = 2, 3, 20, 20
    hidden_dim, num_objects = 32, 5

    key = jax.random.PRNGKey(0)
    k_obs, k_w1, k_b1, k_w2, k_b2 = jax.random.split(key, 5)

    obs = jax.random.normal(k_obs, (N, C, H, W), dtype=jnp.float32)
    w1 = jax.random.normal(k_w1, (hidden_dim, C, 10, 10), jnp.float32) * 0.05
    b1 = jax.random.normal(k_b1, (hidden_dim,), jnp.float32) * 0.05
    gamma = jnp.ones((hidden_dim,), jnp.float32)    # BatchNorm2d default init
    beta = jnp.zeros((hidden_dim,), jnp.float32)
    w2 = jax.random.normal(k_w2, (num_objects, hidden_dim, 1, 1), jnp.float32) * 0.1
    b2 = jax.random.normal(k_b2, (num_objects,), jnp.float32) * 0.1

    fwd = jax.jit(encoder_cnn_small)
    out = jax.block_until_ready(fwd(obs, w1, b1, gamma, beta, w2, b2))
    assert out.shape == (N, num_objects, H // 10, W // 10)

    ref = _reference(obs, w1, b1, gamma, beta, w2, b2)
    err = float(jnp.max(jnp.abs(out - ref)))
    assert err < 2e-2, f"max abs error vs reference: {err}"
    print("KERNEL_OK")
</pallas_src>

<mosaic_0001>
module attributes {stable_mosaic.version = 11 : i64} {
  func.func @_fused_kernel(%arg0: i32, %arg1: i32, %arg2: memref<128x384xbf16, #tpu.memory_space<vmem>>, %arg3: memref<384x128xbf16, #tpu.memory_space<vmem>>, %arg4: memref<1x128xf32, #tpu.memory_space<vmem>>, %arg5: memref<1x128xf32, #tpu.memory_space<vmem>>, %arg6: memref<8x128xbf16, #tpu.memory_space<vmem>>, %arg7: memref<8x1xf32, #tpu.memory_space<vmem>>, %arg8: memref<8x128xf32, #tpu.memory_space<vmem>>, %arg9: memref<128x128xf32, #tpu.memory_space<vmem>>, %arg10: memref<1x128xf32, #tpu.memory_space<vmem>>, %arg11: memref<1x128xf32, #tpu.memory_space<vmem>>) attributes {dimension_semantics = [#tpu.dimension_semantics<arbitrary>, #tpu.dimension_semantics<arbitrary>], iteration_bounds = array<i64: 2, 1>, scalar_prefetch = 0 : i64, scratch_operands = 3 : i64, tpu.core_type = #tpu.core_type<tc>, window_params = [{transform_indices = @transform_0, window_bounds = array<i64: 128, 384>}, {pipeline_mode = #tpu.pipeline_mode<synchronous>, transform_indices = @transform_1, window_bounds = array<i64: 384, 128>}, {pipeline_mode = #tpu.pipeline_mode<synchronous>, transform_indices = @transform_2, window_bounds = array<i64: 1, 128>}, {pipeline_mode = #tpu.pipeline_mode<synchronous>, transform_indices = @transform_3, window_bounds = array<i64: 1, 128>}, {pipeline_mode = #tpu.pipeline_mode<synchronous>, transform_indices = @transform_4, window_bounds = array<i64: 8, 128>}, {pipeline_mode = #tpu.pipeline_mode<synchronous>, transform_indices = @transform_5, window_bounds = array<i64: 8, 1>}, {transform_indices = @transform_6, window_bounds = array<i64: 8, 128>}]} {
    %c128_i32 = arith.constant 128 : i32
    %0 = arith.muli %arg1, %c128_i32 : i32
    %1 = tpu.assume_multiple %0, 128 : i32
    %c0_i32 = arith.constant 0 : i32
    %2 = arith.cmpi eq, %arg0, %c0_i32 : i32
    %c0_i32_0 = arith.constant 0 : i32
    %3 = arith.cmpi eq, %arg1, %c0_i32_0 : i32
    %4 = arith.andi %2, %3 : i1
    %5 = arith.extui %4 : i1 to i32
    %c0_i32_1 = arith.constant 0 : i32
    %6 = arith.cmpi ne, %5, %c0_i32_1 : i32
    scf.if %6 {
      %cst = arith.constant 0.000000e+00 : f32
      %13 = vector.broadcast %cst : f32 to vector<1x128xf32>
      %c0 = arith.constant 0 : index
      %c0_5 = arith.constant 0 : index
      %14 = vector.load %arg10[%c0, %c0_5] : memref<1x128xf32, #tpu.memory_space<vmem>>, vector<1x128xf32>
      tpu.vector_store %arg10[%c0, %c0_5], %13 {strides = array<i32>} : memref<1x128xf32, #tpu.memory_space<vmem>>, vector<1x128xf32>,
      %cst_6 = arith.constant 0.000000e+00 : f32
      %15 = vector.broadcast %cst_6 : f32 to vector<1x128xf32>
      %c0_7 = arith.constant 0 : index
      %c0_8 = arith.constant 0 : index
      %16 = vector.load %arg11[%c0_7, %c0_8] : memref<1x128xf32, #tpu.memory_space<vmem>>, vector<1x128xf32>
      tpu.vector_store %arg11[%c0_7, %c0_8], %15 {strides = array<i32>} : memref<1x128xf32, #tpu.memory_space<vmem>>, vector<1x128xf32>,
    } else {
    }
    %c0_i32_2 = arith.constant 0 : i32
    %7 = arith.cmpi eq, %arg0, %c0_i32_2 : i32
    %8 = arith.extui %7 : i1 to i32
    %c0_i32_3 = arith.constant 0 : i32
    %9 = arith.cmpi ne, %8, %c0_i32_3 : i32
    scf.if %9 {
      %c0 = arith.constant 0 : index
      %c0_5 = arith.constant 0 : index
      %13 = vector.load %arg2[%c0, %c0_5] : memref<128x384xbf16, #tpu.memory_space<vmem>>, vector<128x384xbf16>
      %c0_6 = arith.constant 0 : index
      %c0_7 = arith.constant 0 : index
      %14 = vector.load %arg3[%c0_6, %c0_7] : memref<384x128xbf16, #tpu.memory_space<vmem>>, vector<384x128xbf16>
      %cst = arith.constant dense<0.000000e+00> : vector<128x128xf32>
      %15 = tpu.matmul %13, %14, %cst {dimension_numbers = #tpu.dot_dimension_numbers<[1], [0], [0], [1], [0, 0, 1, 1], [], []>} : vector<128x384xbf16>, vector<384x128xbf16>, vector<128x128xf32> -> vector<128x128xf32>
      %16 = arith.index_cast %1 : i32 to index
      %c0_8 = arith.constant 0 : index
      %17 = vector.load %arg9[%16, %c0_8] : memref<128x128xf32, #tpu.memory_space<vmem>>, vector<128x128xf32>
      tpu.vector_store %arg9[%16, %c0_8], %15 {strides = array<i32>} : memref<128x128xf32, #tpu.memory_space<vmem>>, vector<128x128xf32>,
      %c0_9 = arith.constant 0 : index
      %c0_10 = arith.constant 0 : index
      %18 = vector.load %arg10[%c0_9, %c0_10] : memref<1x128xf32, #tpu.memory_space<vmem>>, vector<1x128xf32>
      %cst_11 = arith.constant dense<0.000000e+00> : vector<128xf32>
      %19 = vector.multi_reduction <add>, %15, %cst_11 [0] : vector<128x128xf32> to vector<128xf32>
      %20 = vector.shape_cast %19 : vector<128xf32> to vector<1x128xf32>
      %21 = arith.addf %18, %20 : vector<1x128xf32>
      %c0_12 = arith.constant 0 : index
      %c0_13 = arith.constant 0 : index
      %22 = vector.load %arg10[%c0_12, %c0_13] : memref<1x128xf32, #tpu.memory_space<vmem>>, vector<1x128xf32>
      tpu.vector_store %arg10[%c0_12, %c0_13], %21 {strides = array<i32>} : memref<1x128xf32, #tpu.memory_space<vmem>>, vector<1x128xf32>,
      %c0_14 = arith.constant 0 : index
      %c0_15 = arith.constant 0 : index
      %23 = vector.load %arg11[%c0_14, %c0_15] : memref<1x128xf32, #tpu.memory_space<vmem>>, vector<1x128xf32>
      %24 = arith.mulf %15, %15 : vector<128x128xf32>
      %cst_16 = arith.constant dense<0.000000e+00> : vector<128xf32>
      %25 = vector.multi_reduction <add>, %24, %cst_16 [0] : vector<128x128xf32> to vector<128xf32>
      %26 = vector.shape_cast %25 : vector<128xf32> to vector<1x128xf32>
      %27 = arith.addf %23, %26 : vector<1x128xf32>
      %c0_17 = arith.constant 0 : index
      %c0_18 = arith.constant 0 : index
      %28 = vector.load %arg11[%c0_17, %c0_18] : memref<1x128xf32, #tpu.memory_space<vmem>>, vector<1x128xf32>
      tpu.vector_store %arg11[%c0_17, %c0_18], %27 {strides = array<i32>} : memref<1x128xf32, #tpu.memory_space<vmem>>, vector<1x128xf32>,
    } else {
    }
    %c1_i32 = arith.constant 1 : i32
    %10 = arith.cmpi eq, %arg0, %c1_i32 : i32
    %11 = arith.extui %10 : i1 to i32
    %c0_i32_4 = arith.constant 0 : i32
    %12 = arith.cmpi ne, %11, %c0_i32_4 : i32
    scf.if %12 {
      %13 = arith.index_cast %1 : i32 to index
      %c0 = arith.constant 0 : index
      %14 = vector.load %arg9[%13, %c0] : memref<128x128xf32, #tpu.memory_space<vmem>>, vector<128x128xf32>
      %c0_5 = arith.constant 0 : index
      %c0_6 = arith.constant 0 : index
      %15 = vector.load %arg10[%c0_5, %c0_6] : memref<1x128xf32, #tpu.memory_space<vmem>>, vector<1x128xf32>
      %c0_7 = arith.constant 0 : index
      %c0_8 = arith.constant 0 : index
      %16 = vector.load %arg11[%c0_7, %c0_8] : memref<1x128xf32, #tpu.memory_space<vmem>>, vector<1x128xf32>
      %c0_9 = arith.constant 0 : index
      %c0_10 = arith.constant 0 : index
      %17 = vector.load %arg4[%c0_9, %c0_10] : memref<1x128xf32, #tpu.memory_space<vmem>>, vector<1x128xf32>
      %c0_11 = arith.constant 0 : index
      %c0_12 = arith.constant 0 : index
      %18 = vector.load %arg5[%c0_11, %c0_12] : memref<1x128xf32, #tpu.memory_space<vmem>>, vector<1x128xf32>
      %c0_13 = arith.constant 0 : index
      %c0_14 = arith.constant 0 : index
      %19 = vector.load %arg6[%c0_13, %c0_14] : memref<8x128xbf16, #tpu.memory_space<vmem>>, vector<8x128xbf16>
      %c0_15 = arith.constant 0 : index
      %c0_16 = arith.constant 0 : index
      %20 = vector.load %arg7[%c0_15, %c0_16] : memref<8x1xf32, #tpu.memory_space<vmem>>, vector<8x1xf32>
      %cst = arith.constant 1.250000e-01 : f32
      %21 = vector.broadcast %cst : f32 to vector<1x128xf32>
      %22 = arith.mulf %15, %21 : vector<1x128xf32>
      %cst_17 = arith.constant 1.250000e-01 : f32
      %23 = vector.broadcast %cst_17 : f32 to vector<1x128xf32>
      %24 = arith.mulf %16, %23 : vector<1x128xf32>
      %25 = arith.mulf %22, %22 : vector<1x128xf32>
      %26 = arith.subf %24, %25 : vector<1x128xf32>
      %cst_18 = arith.constant 0.000000e+00 : f32
      %27 = vector.broadcast %cst_18 : f32 to vector<1x128xf32>
      %28 = arith.maximumf %26, %27 : vector<1x128xf32>
      %cst_19 = arith.constant 9.99999974E-6 : f32
      %29 = vector.broadcast %cst_19 : f32 to vector<1x128xf32>
      %30 = arith.addf %28, %29 : vector<1x128xf32>
      %31 = math.rsqrt %30 : vector<1x128xf32>
      %32 = arith.mulf %17, %31 : vector<1x128xf32>
      %33 = arith.mulf %22, %32 : vector<1x128xf32>
      %34 = arith.subf %18, %33 : vector<1x128xf32>
      %35 = vector.broadcast %32 : vector<1x128xf32> to vector<128x128xf32>
      %36 = arith.mulf %14, %35 : vector<128x128xf32>
      %37 = vector.broadcast %34 : vector<1x128xf32> to vector<128x128xf32>
      %38 = arith.addf %36, %37 : vector<128x128xf32>
      %cst_20 = arith.constant 0.000000e+00 : f32
      %39 = vector.broadcast %cst_20 : f32 to vector<128x128xf32>
      %40 = arith.maximumf %38, %39 : vector<128x128xf32>
      %41 = arith.truncf %40 : vector<128x128xf32> to vector<128x128xbf16>
      %cst_21 = arith.constant dense<0.000000e+00> : vector<8x128xf32>
      %42 = tpu.matmul %19, %41, %cst_21 {dimension_numbers = #tpu.dot_dimension_numbers<[1], [1], [0], [0], [0, 0, 1, 0], [], []>} : vector<8x128xbf16>, vector<128x128xbf16>, vector<8x128xf32> -> vector<8x128xf32>
      %43 = vector.broadcast %20 : vector<8x1xf32> to vector<8x128xf32>
      %44 = arith.addf %42, %43 : vector<8x128xf32>
      %45 = arith.negf %44 : vector<8x128xf32>
      %46 = math.exp %45 : vector<8x128xf32>
      %cst_22 = arith.constant 1.000000e+00 : f32
      %47 = vector.broadcast %cst_22 : f32 to vector<8x128xf32>
      %48 = arith.addf %47, %46 : vector<8x128xf32>
      %49 = arith.divf %47, %48 : vector<8x128xf32>
      %c0_23 = arith.constant 0 : index
      %c0_24 = arith.constant 0 : index
      %50 = vector.load %arg8[%c0_23, %c0_24] : memref<8x128xf32, #tpu.memory_space<vmem>>, vector<8x128xf32>
      tpu.vector_store %arg8[%c0_23, %c0_24], %49 {strides = array<i32>} : memref<8x128xf32, #tpu.memory_space<vmem>>, vector<8x128xf32>,
    } else {
    }
    return
  }
  func.func @transform_0(%arg0: i32, %arg1: i32) -> (i32, i32) {
    %c1_i32 = arith.constant 1 : i32
    %0 = arith.subi %c1_i32, %arg0 : i32
    %1 = arith.muli %arg1, %0 : i32
    %c0_i32 = arith.constant 0 : i32
    %c0_i32_0 = arith.constant 0 : i32
    return %1, %c0_i32 : i32, i32
  }
  func.func @transform_1(%arg0: i32, %arg1: i32) -> (i32, i32) {
    %c0_i32 = arith.constant 0 : i32
    %c0_i32_0 = arith.constant 0 : i32
    %c0_i32_1 = arith.constant 0 : i32
    return %c0_i32, %c0_i32_0 : i32, i32
  }
  func.func @transform_2(%arg0: i32, %arg1: i32) -> (i32, i32) {
    %c0_i32 = arith.constant 0 : i32
    %c0_i32_0 = arith.constant 0 : i32
    %c0_i32_1 = arith.constant 0 : i32
    return %c0_i32, %c0_i32_0 : i32, i32
  }
  func.func @transform_3(%arg0: i32, %arg1: i32) -> (i32, i32) {
    %c0_i32 = arith.constant 0 : i32
    %c0_i32_0 = arith.constant 0 : i32
    %c0_i32_1 = arith.constant 0 : i32
    return %c0_i32, %c0_i32_0 : i32, i32
  }
  func.func @transform_4(%arg0: i32, %arg1: i32) -> (i32, i32) {
    %c0_i32 = arith.constant 0 : i32
    %c0_i32_0 = arith.constant 0 : i32
    %c0_i32_1 = arith.constant 0 : i32
    return %c0_i32, %c0_i32_0 : i32, i32
  }
  func.func @transform_5(%arg0: i32, %arg1: i32) -> (i32, i32) {
    %c0_i32 = arith.constant 0 : i32
    %c0_i32_0 = arith.constant 0 : i32
    %c0_i32_1 = arith.constant 0 : i32
    return %c0_i32, %c0_i32_0 : i32, i32
  }
  func.func @transform_6(%arg0: i32, %arg1: i32) -> (i32, i32) {
    %0 = arith.muli %arg1, %arg0 : i32
    %c0_i32 = arith.constant 0 : i32
    %c0_i32_0 = arith.constant 0 : i32
    return %c0_i32, %0 : i32, i32
  }
}

</mosaic_0001>

<bundles_post_ra>
// kernel: encoder_cnn_small.1
= control target key start
LH: loop header
LB: loop body
LE: loop exit
PB: predicated region body
PF: predicated region fallthrough
CT: control target
= control target key end

     0   :  { %s1510_s21 = smov 0   ;;  %s1512_s22 = smov 0   ;;  %s1752_s0 = inlined_call_operand.vmem [shape: bf16[128,384], index: 0, kind: input, shape index: {}]   ;;  %s1753_s1 = inlined_call_operand.vmem [shape: bf16[384,128], index: 1, kind: input, shape index: {}]   ;;  %s1754_s2 = inlined_call_operand.vmem [shape: f32[1,128], index: 2, kind: input, shape index: {}]   ;;  %s1755_s3 = inlined_call_operand.vmem [shape: f32[1,128], index: 3, kind: input, shape index: {}]   ;;  %s1756_s4 = inlined_call_operand.vmem [shape: bf16[8,128], index: 4, kind: input, shape index: {}]   ;;  %s1757_s5 = inlined_call_operand.vmem [shape: f32[8,1], index: 5, kind: input, shape index: {}]   ;;  %s1758_s6 = inlined_call_operand.vmem [shape: f32[8,128], index: 6, kind: output, shape index: {}]  }
   0x1   :  { %s1514_s23 = smov 0  }
   0x2 LB: > { %s28_s24 = sadd.s32 1, %s1465_s22  ;;  %p1157_p0 = scmp.ge.s32.totalorder %s1469_s23, 1  ;;  %s1469_s23 = sphi %s1514_s23, %s16_s23   ;;  %s1465_s22 = sphi %s1512_s22, %s1760_s22   ;;  %s1461_s21 = sphi %s1510_s21, %s1759_s21  }
   0x3   : > { %p30_p1 = scmp.ge.s32.totalorder %s28_s24, 2  ;;  %p236_p2 = scmp.lt.s32.totalorder %s1469_s23, 3 }
   0x5   : > { %s1762_s24 = smov (%p30_p1, %s28_s24), 0  ;;  %p237_p3 = pnand %p1157_p0, %p236_p2 }
   0x6   : > { %p288_p4 = scmp.eq.s32.totalorder (!%p237_p3), %s1461_s21, 0 }
   0x7   : > { %240 = sbr.rel (%p237_p3) target bundleno = 693 (0x2b5), region = 44 }
   0xe   : > { %293 = sbr.rel (!%p288_p4) target bundleno = 21 (0x15), region = 48  ;;  %v1471_v0 = vmov (%p288_p4), 0.0  }
   0xf   : > { %294 = vst [vmem:[#allocation3] sm:$0x1] (%p288_p4), %v1471_v0  ;;  %295 = vst [vmem:[#allocation4] sm:$0x1] (%p288_p4), %v1471_v0 }
  0x15 PF: > { %p1159_p5 = scmp.ne.s32.totalorder %s1461_s21, 0 }
  0x16   : > { %v1384_v1 = vld [vmem:[%s1753_s1 + $0x40] sm:$0xff] (!%p1159_p5)   ;;  %v1387_v4 = vld [vmem:[%s1753_s1 + $0x48] sm:$0xff] (!%p1159_p5)   ;;  %v1390_v7 = vld [vmem:[%s1753_s1 + $0x50] sm:$0xff] (!%p1159_p5)  }
  0x17   : > { %298 = sbr.rel (%p1159_p5) target bundleno = 349 (0x15d), region = 52  ;;  %v1385_v2 = vld [vmem:[%s1753_s1] sm:$0xff] (!%p1159_p5)   ;;  %1215 = vmatprep.subr.bf16.mxu0 (!%p1159_p5), %v1384_v1  ;;  %v1388_v5 = vld [vmem:[%s1753_s1 + $0x8] sm:$0xff] (!%p1159_p5)   ;;  %v1391_v8 = vld [vmem:[%s1753_s1 + $0x10] sm:$0xff] (!%p1159_p5)  }
  0x18   : > { %v1386_v3 = vld [vmem:[%s1753_s1 + $0x80] sm:$0xff] (!%p1159_p5)   ;;  %1216 = vmatpush3.bf16.msra.mxu0 (!%p1159_p5), %v1385_v2  ;;  %v1389_v6 = vld [vmem:[%s1753_s1 + $0x88] sm:$0xff] (!%p1159_p5)   ;;  %v1392_v9 = vld [vmem:[%s1753_s1 + $0x90] sm:$0xff] (!%p1159_p5)  }
  0x19   : > { %1304 = vmatprep.subr.bf16.mxu1 (!%p1159_p5), %v1386_v3  ;;  %1217 = vmatprep.subr.bf16.mxu0 (!%p1159_p5), %v1387_v4  ;;  %v1393_v10 = vld [vmem:[%s1753_s1 + $0x58] sm:$0xff] (!%p1159_p5)   ;;  %v1396_v13 = vld [vmem:[%s1753_s1 + $0x60] sm:$0xff] (!%p1159_p5)   ;;  %v1399_v16 = vld [vmem:[%s1753_s1 + $0x68] sm:$0xff] (!%p1159_p5)  }
  0x1a   : > { %1305 = vmatpush3.bf16.msra.mxu1 (!%p1159_p5), %v1386_v3  ;;  %v1394_v11 = vld [vmem:[%s1753_s1 + $0x18] sm:$0xff] (!%p1159_p5)   ;;  %v1398_v14 = vld [vmem:[%s1753_s1 + $0xa0] sm:$0xff] (!%p1159_p5)   ;;  %v1401_v17 = vld [vmem:[%s1753_s1 + $0xa8] sm:$0xff] (!%p1159_p5)  }
  0x1b   : > { %1306 = vmatprep.subr.bf16.mxu1 (!%p1159_p5), %v1389_v6  ;;  %v1395_v12 = vld [vmem:[%s1753_s1 + $0x98] sm:$0xff] (!%p1159_p5)   ;;  %v1397_v15 = vld [vmem:[%s1753_s1 + $0x20] sm:$0xff] (!%p1159_p5)   ;;  %v1400_v18 = vld [vmem:[%s1753_s1 + $0x28] sm:$0xff] (!%p1159_p5)  }
  0x1c   : > { %1218 = vmatpush3.bf16.msra.mxu0 (!%p1159_p5), %v1388_v5  ;;  %v1402_v19 = vld [vmem:[%s1753_s1 + $0x70] sm:$0xff] (!%p1159_p5)   ;;  %v1405_v22 = vld [vmem:[%s1753_s1 + $0x78] sm:$0xff] (!%p1159_p5)   ;;  %v1408_v27 = vld [vmem:[%s1752_s0] ss:$12 sps:$4 sm:$0xff] (!%p1159_p5)  }
  0x1d   : > { %1219 = vmatprep.subr.bf16.mxu0 (!%p1159_p5), %v1390_v7  ;;  %v1403_v20 = vld [vmem:[%s1753_s1 + $0x30] sm:$0xff] (!%p1159_p5)   ;;  %v1407_v23 = vld [vmem:[%s1753_s1 + $0xb8] sm:$0xff] (!%p1159_p5)   ;;  %v1412_v29 = vld [vmem:[%s1752_s0 + $0x20] ss:$12 sps:$4 sm:$0xff] (!%p1159_p5)  }
  0x1e   : > { %1307 = vmatpush3.bf16.msra.mxu1 %v1389_v6  ;;  %v1404_v21 = vld [vmem:[%s1753_s1 + $0xb0] sm:$0xff]   ;;  %v1406_v26 = vld [vmem:[%s1753_s1 + $0x38] sm:$0xff]   ;;  %v1428_v37 = vld [vmem:[%s1752_s0 + $0x80] ss:$12 sps:$4 sm:$0xff]  }
  0x1f   : > { %1308 = vmatprep.subr.bf16.mxu1 %v1392_v9  ;;  %v1410_v24 = vld [vmem:[%s1752_s0 + $0x4] ss:$12 sps:$4 sm:$0xff]   ;;  %v1411_v25 = vld [vmem:[%s1752_s0 + $0x8] ss:$12 sps:$4 sm:$0xff]   ;;  %v1421_v36 = vld [vmem:[%s1752_s0 + $0x4c] ss:$12 sps:$4 sm:$0xff]  }
  0x20   : > { %1220 = vmatpush3.bf16.msra.mxu0 %v1391_v8  ;;  %683 = vmatprep.mubr.bf16.mxu0 %v1410_v24  ;;  %v1413_v28 = vld [vmem:[%s1752_s0 + $0x1c] ss:$12 sps:$4 sm:$0xff]   ;;  %v1419_v30 = vld [vmem:[%s1752_s0 + $0x38] ss:$12 sps:$4 sm:$0xff]   ;;  %v1416_v32 = vld [vmem:[%s1752_s0 + $0x34] ss:$12 sps:$4 sm:$0xff]  }
  0x21   : > { %1221 = vmatprep.subr.bf16.mxu0 %v1393_v10  ;;  %1320 = vmatprep.mubr.bf16.mxu1 %v1411_v25  ;;  %v1415_v31 = vld [vmem:[%s1752_s0 + $0x18] ss:$12 sps:$4 sm:$0xff]   ;;  %v1420_v33 = vld [vmem:[%s1752_s0 + $0x50] ss:$12 sps:$4 sm:$0xff]   ;;  %v1427_v34 = vld [vmem:[%s1752_s0 + $0x68] ss:$12 sps:$4 sm:$0xff]  }
  0x22   : > { %1309 = vmatpush3.bf16.msra.mxu1 %v1392_v9  ;;  %v1418_v35 = vld [vmem:[%s1752_s0 + $0x30] ss:$12 sps:$4 sm:$0xff]   ;;  %v1435_v38 = vld [vmem:[%s1752_s0 + $0x98] ss:$12 sps:$4 sm:$0xff]   ;;  %v1423_v39 = vld [vmem:[%s1752_s0 + $0x48] ss:$12 sps:$4 sm:$0xff]  }
  0x23   : > { %1310 = vmatprep.subr.bf16.mxu1 %v1395_v12  ;;  %v1424_v40 = vld [vmem:[%s1752_s0 + $0x64] ss:$12 sps:$4 sm:$0xff]   ;;  %v1426_v42 = vld [vmem:[%s1752_s0 + $0x60] ss:$12 sps:$4 sm:$0xff]   ;;  %v1429_v43 = vld [vmem:[%s1752_s0 + $0x7c] ss:$12 sps:$4 sm:$0xff]  }
  0x24   : > { %1222 = vmatpush3.bf16.msra.mxu0 %v1394_v11  ;;  %v1436_v41 = vld [vmem:[%s1752_s0 + $0xb0] ss:$12 sps:$4 sm:$0xff]   ;;  %v1431_v44 = vld [vmem:[%s1752_s0 + $0x78] ss:$12 sps:$4 sm:$0xff]   ;;  %v1432_v45 = vld [vmem:[%s1752_s0 + $0x94] ss:$12 sps:$4 sm:$0xff]  }
  0x25   : > { %1223 = vmatprep.subr.bf16.mxu0 %v1396_v13  ;;  %v1434_v46 = vld [vmem:[%s1752_s0 + $0x90] ss:$12 sps:$4 sm:$0xff]   ;;  %v1437_v47 = vld [vmem:[%s1752_s0 + $0xac] ss:$12 sps:$4 sm:$0xff]   ;;  %v1439_v48 = vld [vmem:[%s1752_s0 + $0xa8] ss:$12 sps:$4 sm:$0xff]  }
  0x26   : > { %1311 = vmatpush3.bf16.msra.mxu1 %v1395_v12 }
  0x27   : > { %1312 = vmatprep.subr.bf16.mxu1 %v1398_v14 }
  0x28   : > { %1224 = vmatpush3.bf16.msra.mxu0 %v1397_v15 }
  0x29   : > { %1225 = vmatprep.subr.bf16.mxu0 %v1399_v16 }
  0x2a   : > { %1313 = vmatpush3.bf16.msra.mxu1 %v1398_v14 }
  0x2b   : > { %1314 = vmatprep.subr.bf16.mxu1 %v1401_v17 }
  0x2c   : > { %1226 = vmatpush3.bf16.msra.mxu0 %v1400_v18 }
  0x2d   : > { %1227 = vmatprep.subr.bf16.mxu0 %v1402_v19 }
  0x2e   : > { %1315 = vmatpush3.bf16.msra.mxu1 %v1401_v17 }
  0x2f   : > { %1316 = vmatprep.subr.bf16.mxu1 %v1404_v21 }
  0x30   : > { %1228 = vmatpush3.bf16.msra.mxu0 %v1403_v20 }
  0x31   : > { %1229 = vmatprep.subr.bf16.mxu0 %v1405_v22 }
  0x32   : > { %1317 = vmatpush3.bf16.msra.mxu1 %v1404_v21 }
  0x33   : > { %1318 = vmatprep.subr.bf16.mxu1 %v1407_v23 }
  0x34   : > { %1230 = vmatpush3.bf16.msra.mxu0 %v1406_v26 }
  0x36   : > { %1319 = vmatpush3.bf16.msra.mxu1 %v1407_v23 }
  0x37   : > { %684 = vmatmul.mubr.bf16.vlgmr.msra.gmra.mrb[0].mxu0 %v1408_v27 }
  0x38   : > { %691 = vmatprep.mubr.bf16.mxu0 %v1413_v28 }
  0x39   : > { %1321 = vmatmul.mubr.bf16.vlgmr.msra.gmra.mrb[0].mxu1 %v1412_v29 }
  0x3a   : > { %1324 = vmatprep.mubr.bf16.mxu1 %v1419_v30 }
  0x3f   : > { %692 = vmatmul.mubr.bf16.gmra.mrb[4].mxu0 %v1415_v31 }
  0x40   : > { %699 = vmatprep.mubr.bf16.mxu0 %v1416_v32 }
  0x41   : > { %1325 = vmatmul.mubr.bf16.gmra.mrb[4].mxu1 %v1420_v33 }
  0x42   : > { %1328 = vmatprep.mubr.bf16.mxu1 %v1427_v34 }
  0x47   : > { %700 = vmatmul.mubr.bf16.gmra.mrb[8].mxu0 %v1418_v35 }
  0x48   : > { %707 = vmatprep.mubr.bf16.mxu0 %v1421_v36 }
  0x49   : > { %1329 = vmatmul.mubr.bf16.gmra.mrb[8].mxu1 %v1428_v37 }
  0x4a   : > { %1332 = vmatprep.mubr.bf16.mxu1 %v1435_v38 }
  0x4f   : > { %708 = vmatmul.mubr.bf16.gmra.mrb[12].mxu0 %v1423_v39 }
  0x50   : > { %715 = vmatprep.mubr.bf16.mxu0 %v1424_v40 }
  0x51   : > { %1333 = vmatmul.mubr.bf16.gmra.mrb[12].mxu1 %v1436_v41 }
  0x57   : > { %716 = vmatmul.mubr.bf16.gmra.mrb[16].mxu0 %v1426_v42 }
  0x58   : > { %723 = vmatprep.mubr.bf16.mxu0 %v1429_v43 }
  0x5f   : > { %724 = vmatmul.mubr.bf16.gmra.mrb[20].mxu0 %v1431_v44 }
  0x60   : > { %731 = vmatprep.mubr.bf16.mxu0 %v1432_v45 }
  0x67   : > { %732 = vmatmul.mubr.bf16.gmra.mrb[24].mxu0 %v1434_v46 }
  0x68   : > { %739 = vmatprep.mubr.bf16.mxu0 %v1437_v47 }
  0x6f   : > { %740 = vmatmul.mubr.bf16.gmra.mrb[28].mxu0 %v1439_v48 }
 0x10a   : > { %v1231_v49 = vpop.f32.mrb[0].mxu0 }
 0x10b   : > { %v1232_v50 = vpop.f32.mrb[1].mxu0 }
 0x10c   : > { %v1233_v51 = vadd.f32 %v1232_v50, %v1231_v49  ;;  %v1234_v52 = vpop.f32.mrb[2].mxu0  ;;  %v1322_v53 = vpop.f32.mrb[0].mxu1 }
 0x10d   : > { %v1235_v54 = vpop.f32.mrb[3].mxu0  ;;  %v782_v55 = vpop.f32.mrb[1].mxu1 }
 0x10e   : > { %v1236_v56 = vadd.f32 %v1235_v54, %v1234_v52  ;;  %v783_v57 = vadd.f32 %v1233_v51, %v782_v55  ;;  %v1323_v58 = vpop.f32.mrb[2].mxu1 }
 0x10f   : > { %v785_v59 = vpop.f32.mrb[3].mxu1 }
 0x110   : > { %846 = vst [vmem:[#allocation2] sm:$0xff] %v783_v57  ;;  %v786_v60 = vadd.f32 %v1236_v56, %v785_v59  ;;  %v887_v61 = vmul.f32 %v783_v57, %v783_v57 }
 0x112   : > { %847 = vst [vmem:[#allocation2 + $0x8] sm:$0xff] %v786_v60  ;;  %v863_v62 = vadd.f32 %v786_v60, %v783_v57  ;;  %v888_v63 = vmul.f32 %v786_v60, %v786_v60  ;;  %v1237_v0 = vpop.f32.mrb[4].mxu0 }
 0x113   : > { %v1238_v1 = vpop.f32.mrb[5].mxu0 }
 0x114   : > { %v903_v2 = vadd.f32 %v888_v63, %v887_v61  ;;  %v1239_v3 = vadd.f32 %v1238_v1, %v1237_v0  ;;  %v1240_v4 = vpop.f32.mrb[6].mxu0  ;;  %v1326_v5 = vpop.f32.mrb[4].mxu1 }
 0x115   : > { %v1241_v6 = vpop.f32.mrb[7].mxu0  ;;  %v798_v7 = vpop.f32.mrb[5].mxu1 }
 0x116   : > { %v791_v8 = vadd.f32 %v1322_v53, %v1239_v3  ;;  %v1242_v9 = vadd.f32 %v1241_v6, %v1240_v4  ;;  %v1327_v10 = vpop.f32.mrb[6].mxu1 }
 0x117   : > { %v801_v11 = vpop.f32.mrb[7].mxu1 }
 0x118   : > { %848 = vst [vmem:[#allocation2 + $0x10] sm:$0xff] %v791_v8  ;;  %v864_v12 = vadd.f32 %v863_v62, %v791_v8  ;;  %v889_v13 = vmul.f32 %v791_v8, %v791_v8  ;;  %v794_v14 = vadd.f32 %v1323_v58, %v1242_v9 }
 0x11a   : > { %v904_v15 = vadd.f32 %v903_v2, %v889_v13  ;;  %849 = vst [vmem:[#allocation2 + $0x18] sm:$0xff] %v794_v14  ;;  %v890_v16 = vmul.f32 %v794_v14, %v794_v14  ;;  %v1243_v17 = vpop.f32.mrb[8].mxu0  ;;  %v865_v18 = vadd.f32 %v864_v12, %v794_v14 }
 0x11b   : > { %v1244_v19 = vpop.f32.mrb[9].mxu0 }
 0x11c   : > { %v1245_v20 = vadd.f32 %v1244_v19, %v1243_v17  ;;  %v1246_v21 = vpop.f32.mrb[10].mxu0  ;;  %v905_v22 = vadd.f32 %v904_v15, %v890_v16  ;;  %v1330_v23 = vpop.f32.mrb[8].mxu1 }
 0x11d   : > { %v1247_v24 = vpop.f32.mrb[11].mxu0  ;;  %v814_v25 = vpop.f32.mrb[9].mxu1 }
 0x11e   : > { %v1248_v26 = vadd.f32 %v1247_v24, %v1246_v21  ;;  %v799_v27 = vadd.f32 %v1245_v20, %v798_v7  ;;  %v1331_v28 = vpop.f32.mrb[10].mxu1 }
 0x11f   : > { %v817_v29 = vpop.f32.mrb[11].mxu1 }
 0x120   : > { %850 = vst [vmem:[#allocation2 + $0x20] sm:$0xff] %v799_v27  ;;  %v866_v30 = vadd.f32 %v865_v18, %v799_v27  ;;  %v891_v31 = vmul.f32 %v799_v27, %v799_v27  ;;  %v802_v32 = vadd.f32 %v1248_v26, %v801_v11 }
 0x122   : > { %v906_v33 = vadd.f32 %v905_v22, %v891_v31  ;;  %851 = vst [vmem:[#allocation2 + $0x28] sm:$0xff] %v802_v32  ;;  %v867_v34 = vadd.f32 %v866_v30, %v802_v32  ;;  %v892_v35 = vmul.f32 %v802_v32, %v802_v32  ;;  %v1249_v36 = vpop.f32.mrb[12].mxu0 }
 0x123   : > { %v1250_v37 = vpop.f32.mrb[13].mxu0 }
 0x124   : > { %v907_v38 = vadd.f32 %v906_v33, %v892_v35  ;;  %v1251_v39 = vadd.f32 %v1250_v37, %v1249_v36  ;;  %v1252_v40 = vpop.f32.mrb[14].mxu0  ;;  %v1676_v41 = vpop.f32.mrb[12].mxu1 }
 0x125   : > { %v1253_v42 = vpop.f32.mrb[15].mxu0  ;;  %v830_v43 = vpop.f32.mrb[13].mxu1 }
 0x126   : > { %v807_v44 = vadd.f32 %v1326_v5, %v1251_v39  ;;  %v1254_v45 = vadd.f32 %v1253_v42, %v1252_v40  ;;  %v1678_v46 = vpop.f32.mrb[14].mxu1 }
 0x127   : > { %v833_v47 = vpop.f32.mrb[15].mxu1 }
 0x128   : > { %852 = vst [vmem:[#allocation2 + $0x30] sm:$0xff] %v807_v44  ;;  %v868_v48 = vadd.f32 %v867_v34, %v807_v44  ;;  %v893_v49 = vmul.f32 %v807_v44, %v807_v44  ;;  %v810_v50 = vadd.f32 %v1327_v10, %v1254_v45 }
 0x12a   : > { %v908_v51 = vadd.f32 %v907_v38, %v893_v49  ;;  %853 = vst [vmem:[#allocation2 + $0x38] sm:$0xff] %v810_v50  ;;  %v894_v52 = vmul.f32 %v810_v50, %v810_v50  ;;  %v1255_v53 = vpop.f32.mrb[16].mxu0  ;;  %v869_v54 = vadd.f32 %v868_v48, %v810_v50 }
 0x12b   : > { %v1256_v55 = vpop.f32.mrb[17].mxu0 }
 0x12c   : > { %v1257_v56 = vadd.f32 %v1256_v55, %v1255_v53  ;;  %v1258_v57 = vpop.f32.mrb[18].mxu0  ;;  %v909_v58 = vadd.f32 %v908_v51, %v894_v52 }
 0x12d   : > { %v1259_v59 = vpop.f32.mrb[19].mxu0 }
 0x12e   : > { %v1260_v60 = vadd.f32 %v1259_v59, %v1258_v57  ;;  %v815_v61 = vadd.f32 %v1257_v56, %v814_v25  ;;  %v862_v57 = vld [vmem:[#allocation3] sm:$0x1] }
 0x130   : > { %854 = vst [vmem:[#allocation2 + $0x40] sm:$0xff] %v815_v61  ;;  %v870_v62 = vadd.f32 %v869_v54, %v815_v61  ;;  %v895_v63 = vmul.f32 %v815_v61, %v815_v61  ;;  %v818_v0 = vadd.f32 %v1260_v60, %v817_v29  ;;  %v886_v60 = vld [vmem:[#allocation4] sm:$0x1] }
 0x132   : > { %v910_v1 = vadd.f32 %v909_v58, %v895_v63  ;;  %855 = vst [vmem:[#allocation2 + $0x48] sm:$0xff] %v818_v0  ;;  %v871_v2 = vadd.f32 %v870_v62, %v818_v0  ;;  %v896_v3 = vmul.f32 %v818_v0, %v818_v0  ;;  %v1261_v4 = vpop.f32.mrb[20].mxu0 }
 0x133   : > { %v1262_v5 = vpop.f32.mrb[21].mxu0 }
 0x134   : > { %v911_v6 = vadd.f32 %v910_v1, %v896_v3  ;;  %v1263_v7 = vadd.f32 %v1262_v5, %v1261_v4  ;;  %v1264_v8 = vpop.f32.mrb[22].mxu0 }
 0x135   : > { %v1265_v9 = vpop.f32.mrb[23].mxu0 }
 0x136   : > { %v823_v10 = vadd.f32 %v1330_v23, %v1263_v7  ;;  %v1266_v11 = vadd.f32 %v1265_v9, %v1264_v8 }
 0x138   : > { %856 = vst [vmem:[#allocation2 + $0x50] sm:$0xff] %v823_v10  ;;  %v872_v12 = vadd.f32 %v871_v2, %v823_v10  ;;  %v897_v13 = vmul.f32 %v823_v10, %v823_v10  ;;  %v826_v14 = vadd.f32 %v1331_v28, %v1266_v11 }
 0x13a   : > { %v912_v15 = vadd.f32 %v911_v6, %v897_v13  ;;  %857 = vst [vmem:[#allocation2 + $0x58] sm:$0xff] %v826_v14  ;;  %v898_v16 = vmul.f32 %v826_v14, %v826_v14  ;;  %v1267_v17 = vpop.f32.mrb[24].mxu0  ;;  %v873_v18 = vadd.f32 %v872_v12, %v826_v14 }
 0x13b   : > { %v1268_v19 = vpop.f32.mrb[25].mxu0 }
 0x13c   : > { %v1269_v20 = vadd.f32 %v1268_v19, %v1267_v17  ;;  %v1270_v21 = vpop.f32.mrb[26].mxu0  ;;  %v913_v22 = vadd.f32 %v912_v15, %v898_v16 }
 0x13d   : > { %v1271_v24 = vpop.f32.mrb[27].mxu0 }
 0x13e   : > { %v1272_v25 = vadd.f32 %v1271_v24, %v1270_v21  ;;  %v831_v26 = vadd.f32 %v1269_v20, %v830_v43 }
 0x140   : > { %858 = vst [vmem:[#allocation2 + $0x60] sm:$0xff] %v831_v26  ;;  %v874_v27 = vadd.f32 %v873_v18, %v831_v26  ;;  %v899_v23 = vmul.f32 %v831_v26, %v831_v26  ;;  %v834_v29 = vadd.f32 %v1272_v25, %v833_v47 }
 0x142   : > { %v914_v30 = vadd.f32 %v913_v22, %v899_v23  ;;  %859 = vst [vmem:[#allocation2 + $0x68] sm:$0xff] %v834_v29  ;;  %v875_v31 = vadd.f32 %v874_v27, %v834_v29  ;;  %v900_v28 = vmul.f32 %v834_v29, %v834_v29  ;;  %v1273_v32 = vpop.f32.mrb[28].mxu0 }
 0x143   : > { %v1274_v33 = vpop.f32.mrb[29].mxu0 }
 0x144   : > { %v915_v34 = vadd.f32 %v914_v30, %v900_v28  ;;  %v1275_v35 = vadd.f32 %v1274_v33, %v1273_v32  ;;  %v1276_v36 = vpop.f32.mrb[30].mxu0 }
 0x145   : > { %v1277_v37 = vpop.f32.mrb[31].mxu0 }
 0x146   : > { %v839_v38 = vadd.f32 %v1676_v41, %v1275_v35  ;;  %v1278_v39 = vadd.f32 %v1277_v37, %v1276_v36 }
 0x148   : > { %860 = vst [vmem:[#allocation2 + $0x70] sm:$0xff] %v839_v38  ;;  %v876_v40 = vadd.f32 %v875_v31, %v839_v38  ;;  %v901_v42 = vmul.f32 %v839_v38, %v839_v38  ;;  %v842_v43 = vadd.f32 %v1678_v46, %v1278_v39 }
 0x14a   : > { %v916_v44 = vadd.f32 %v915_v34, %v901_v42  ;;  %861 = vst [vmem:[#allocation2 + $0x78] sm:$0xff] %v842_v43  ;;  %v877_v45 = vadd.f32 %v876_v40, %v842_v43  ;;  %v902_v47 = vmul.f32 %v842_v43, %v842_v43 }
 0x14c   : > { %v878_v48 = vrot.slane %v877_v45, 4  ;;  %v917_v49 = vadd.f32 %v916_v44, %v902_v47 }
 0x14e   : > { %v879_v50 = vadd.f32 %v878_v48, %v877_v45  ;;  %v918_v51 = vrot.slane %v917_v49, 4 }
 0x150   : > { %v880_v52 = vrot.slane %v879_v50, 2  ;;  %v919_v53 = vadd.f32 %v918_v51, %v917_v49 }
 0x152   : > { %v881_v54 = vadd.f32 %v880_v52, %v879_v50  ;;  %v920_v55 = vrot.slane %v919_v53, 2 }
 0x154   : > { %v882_v56 = vrot.slane %v881_v54, 1  ;;  %v921_v41 = vadd.f32 %v920_v55, %v919_v53 }
 0x156   : > { %v883_v58 = vadd.f32 %v882_v56, %v881_v54  ;;  %v922_v59 = vrot.slane %v921_v41, 1 }
 0x158   : > { %v884_v61 = vadd.f32 %v883_v58, %v862_v57  ;;  %v923_v46 = vadd.f32 %v922_v59, %v921_v41 }
 0x15a   : > { %885 = vst [vmem:[#allocation3] sm:$0x1] %v884_v61  ;;  %v924_v62 = vadd.f32 %v923_v46, %v886_v60 }
 0x15c   : > { %925 = vst [vmem:[#allocation4] sm:$0x1] %v924_v62 }
 0x15d PF: > { %p1208_p6 = scmp.ne.s32.totalorder %s1461_s21, 1 }
 0x15e   : > { %v1472_v0 = vmov (!%p1208_p6), 0.0   ;;  %vm1473_vm0 = vmmov (!%p1208_p6), 0   ;;  %v1474_v5 = vmov (!%p1208_p6), 0   ;;  %v952_v7 = vld [vmem:[%s1757_s5] sm:$0xff] (!%p1208_p6)  ;;  %v964_v10 = vlaneseq (!%p1208_p6)  ;;  %v932_v17 = vld [vmem:[#allocation2 + $0x8] sm:$0xff] (!%p1208_p6)  ;;  %v933_v21 = vld [vmem:[#allocation2 + $0x10] sm:$0xff] (!%p1208_p6) }
 0x15f   : > { %929 = sbr.rel (%p1208_p6) target bundleno = 693 (0x2b5), region = 56  ;;  %1336 = vmatprep.subr.bf16.mxu0 (!%p1208_p6), %v1472_v0  ;;  %1352 = vmatprep.mubr.msk.bf16.mxu0 (!%p1208_p6), %vm1473_vm0, %v1472_v0  ;;  %v949_v12 = vld [vmem:[%s1754_s2] sm:$0x1] (!%p1208_p6)  ;;  %v934_v22 = vld [vmem:[#allocation2 + $0x18] sm:$0xff] (!%p1208_p6)  ;;  %v936_v36 = vld [vmem:[#allocation2 + $0x28] sm:$0xff] (!%p1208_p6) }
 0x160   : > { %1440 = vset.pattern.permute.xlu0 (!%p1208_p6), %v1474_v5  ;;  %v965_v11 = vshrl.u32 (!%p1208_p6), %v964_v10, 7  ;;  %v931_v16 = vld [vmem:[#allocation2] sm:$0xff] (!%p1208_p6)  ;;  %v937_v47 = vld [vmem:[#allocation2 + $0x30] sm:$0xff] (!%p1208_p6)  ;;  %v938_v48 = vld [vmem:[#allocation2 + $0x38] sm:$0xff] (!%p1208_p6) }
 0x161   : > { %v947_v63 = vld [vmem:[#allocation3] sm:$0x1] (!%p1208_p6)  ;;  %1033 = vperm.xlu0 (!%p1208_p6), %1440, %v952_v7   ;;  %v940_v41 = vld [vmem:[#allocation2 + $0x48] sm:$0xff] (!%p1208_p6) }
 0x162   : > { %v953_v2 = vmul.f32 (!%p1208_p6), 0.125, %v947_v63  ;;  %v966_v13 = vsub.s32 (!%p1208_p6), 0, %v965_v11  ;;  %v950_v18 = vld [vmem:[%s1755_s3] sm:$0x1] (!%p1208_p6)  ;;  %v941_v63 = vld [vmem:[#allocation2 + $0x50] sm:$0xff] (!%p1208_p6)  ;;  %v944_v10 = vld [vmem:[#allocation2 + $0x68] sm:$0xff] (!%p1208_p6) }
 0x163   : > { %v948_v1 = vld [vmem:[#allocation4] sm:$0x1] (!%p1208_p6) }
 0x164   : > { %v954_v3 = vmul.f32 (!%p1208_p6), 0.125, %v948_v1  ;;  %v955_v4 = vmul.f32 (!%p1208_p6), %v953_v2, %v953_v2  ;;  %v935_v35 = vld [vmem:[#allocation2 + $0x20] sm:$0xff] (!%p1208_p6)  ;;  %v942_v1 = vld [vmem:[#allocation2 + $0x58] sm:$0xff] (!%p1208_p6) }
 0x165   : > { %v939_v56 = vld [vmem:[#allocation2 + $0x40] sm:$0xff] (!%p1208_p6) }
 0x166   : > { %v956_v6 = vsub.f32 %v954_v3, %v955_v4 }
 0x168   : > { %v957_v8 = vmax.f32 %v956_v6, 0.0 }
 0x16a   : > { %v958_v9 = vadd.f32 1e-05, %v957_v8 }
 0x16c   : > { %1441 = vrsqrt.f32 %v958_v9  ;;  %v943_v9 = vld [vmem:[#allocation2 + $0x60] sm:$0xff] }
 0x176   : > { %v1442_v14 = vpop.eup %1441 }
 0x177   : > { %v960_v15 = vmul.f32 %v1442_v14, %v949_v12 }
 0x179   : > { %v961_v19 = vmul.f32 %v960_v15, %v953_v2  ;;  %v1694_v20 = vrot.slane %v960_v15, %v966_v13 }
 0x17b   : > { %v962_v24 = vsub.f32 %v950_v18, %v961_v19  ;;  %v969_v25 = vmul.f32 %v1694_v20, %v931_v16  ;;  %v970_v26 = vmul.f32 %v1694_v20, %v932_v17  ;;  %v971_v23 = vmul.f32 %v1694_v20, %v933_v21  ;;  %v945_v18 = vld [vmem:[#allocation2 + $0x70] sm:$0xff]  ;;  %v946_v19 = vld [vmem:[#allocation2 + $0x78] sm:$0xff] }
 0x17c   : > { %v972_v29 = vmul.f32 %v1694_v20, %v934_v22  ;;  %v973_v40 = vmul.f32 %v1694_v20, %v935_v35  ;;  %v974_v42 = vmul.f32 %v1694_v20, %v936_v36  ;;  %v975_v51 = vmul.f32 %v1694_v20, %v937_v47 }
 0x17d   : > { %v1698_v27 = vrot.slane %v962_v24, %v966_v13  ;;  %v976_v52 = vmul.f32 %v1694_v20, %v938_v48  ;;  %v977_v59 = vmul.f32 %v1694_v20, %v939_v56  ;;  %v978_v60 = vmul.f32 %v1694_v20, %v940_v41 }
 0x17e   : > { %v979_v4 = vmul.f32 %v1694_v20, %v941_v63  ;;  %v980_v5 = vmul.f32 %v1694_v20, %v942_v1  ;;  %v981_v13 = vmul.f32 %v1694_v20, %v943_v9  ;;  %v982_v14 = vmul.f32 %v1694_v20, %v944_v10 }
 0x17f   : > { %v991_v30 = vadd.f32 %v1698_v27, %v969_v25  ;;  %v992_v31 = vadd.f32 %v1698_v27, %v970_v26  ;;  %v993_v33 = vadd.f32 %v1698_v27, %v971_v23  ;;  %v994_v34 = vadd.f32 %v1698_v27, %v972_v29 }
 0x180   : > { %v995_v44 = vadd.f32 %v1698_v27, %v973_v40  ;;  %v996_v45 = vadd.f32 %v1698_v27, %v974_v42  ;;  %v997_v54 = vadd.f32 %v1698_v27, %v975_v51  ;;  %v998_v55 = vadd.f32 %v1698_v27, %v976_v52 }
 0x181   : > { %v1007_v28 = vmax.f32 %v991_v30, 0.0  ;;  %v1008_v32 = vmax.f32 %v992_v31, 0.0  ;;  %v1009_v38 = vmax.f32 %v993_v33, 0.0  ;;  %v1010_v39 = vmax.f32 %v994_v34, 0.0 }
 0x182   : > { %v1011_v49 = vmax.f32 %v995_v44, 0.0  ;;  %v1012_v50 = vmax.f32 %v996_v45, 0.0  ;;  %v1013_v57 = vmax.f32 %v997_v54, 0.0  ;;  %v1014_v58 = vmax.f32 %v998_v55, 0.0 }
 0x183   : > { %v1023_v37 = vpack.c.bf16 %v1008_v32, %v1007_v28  ;;  %v1024_v43 = vpack.c.bf16 %v1010_v39, %v1009_v38  ;;  %v999_v46 = vadd.f32 %v1698_v27, %v977_v59  ;;  %v1000_v62 = vadd.f32 %v1698_v27, %v978_v60  ;;  %v951_v32 = vld [vmem:[%s1756_s4] sm:$0xf] }
 0x184   : > { %v1025_v53 = vpack.c.bf16 %v1012_v50, %v1011_v49  ;;  %v1026_v61 = vpack.c.bf16 %v1014_v58, %v1013_v57  ;;  %v1001_v7 = vadd.f32 %v1698_v27, %v979_v4  ;;  %v1002_v8 = vadd.f32 %v1698_v27, %v980_v5 }
 0x185   : > { %1337 = vmatpush3.bf16.xpose.msra.mxu0 %v1023_v37  ;;  %v1015_v2 = vmax.f32 %v999_v46, 0.0  ;;  %v1016_v3 = vmax.f32 %v1000_v62, 0.0  ;;  %v1003_v16 = vadd.f32 %v1698_v27, %v981_v13  ;;  %v1004_v17 = vadd.f32 %v1698_v27, %v982_v14 }
 0x186   : > { %1338 = vmatprep.subr.bf16.mxu0 %v1472_v0  ;;  %v1017_v11 = vmax.f32 %v1001_v7, 0.0  ;;  %v1018_v12 = vmax.f32 %v1002_v8, 0.0  ;;  %v983_v24 = vmul.f32 %v1694_v20, %v945_v18  ;;  %v984_v25 = vmul.f32 %v1694_v20, %v946_v19 }
 0x187   : > { %v1027_v6 = vpack.c.bf16 %v1016_v3, %v1015_v2  ;;  %v1019_v21 = vmax.f32 %v1003_v16, 0.0  ;;  %v1020_v22 = vmax.f32 %v1004_v17, 0.0 }
 0x188   : > { %v1028_v15 = vpack.c.bf16 %v1018_v12, %v1017_v11  ;;  %v1005_v23 = vadd.f32 %v1698_v27, %v983_v24  ;;  %v1006_v29 = vadd.f32 %v1698_v27, %v984_v25 }
 0x189   : > { %v1029_v26 = vpack.c.bf16 %v1020_v22, %v1019_v21 }
 0x18a   : > { %v1021_v30 = vmax.f32 %v1005_v23, 0.0  ;;  %v1022_v31 = vmax.f32 %v1006_v29, 0.0 }
 0x18c   : > { %v1030_v28 = vpack.c.bf16 %v1022_v31, %v1021_v30 }
 0x18d   : > { %1339 = vmatpush3.bf16.xpose.msra.mxu0 %v1024_v43 }
 0x18e   : > { %1340 = vmatprep.subr.bf16.mxu0 %v1472_v0 }
 0x195   : > { %1341 = vmatpush3.bf16.xpose.msra.mxu0 %v1025_v53 }
 0x196   : > { %1342 = vmatprep.subr.bf16.mxu0 %v1472_v0 }
 0x19d   : > { %1343 = vmatpush3.bf16.xpose.msra.mxu0 %v1026_v61 }
 0x19e   : > { %1344 = vmatprep.subr.bf16.mxu0 %v1472_v0 }
 0x1a5   : > { %1345 = vmatpush3.bf16.xpose.msra.mxu0 %v1027_v6 }
 0x1a6   : > { %1346 = vmatprep.subr.bf16.mxu0 %v1472_v0 }
 0x1ad   : > { %1347 = vmatpush3.bf16.xpose.msra.mxu0 %v1028_v15 }
 0x1ae   : > { %1348 = vmatprep.subr.bf16.mxu0 %v1472_v0 }
 0x1b5   : > { %1349 = vmatpush3.bf16.xpose.msra.mxu0 %v1029_v26 }
 0x1b6   : > { %1350 = vmatprep.subr.bf16.mxu0 %v1472_v0 }
 0x1bd   : > { %1351 = vmatpush3.bf16.xpose.msra.mxu0 %v1030_v28 }
 0x1c4   : > { %1353 = vmatmul.mubr.bf16.vlgmr.msra.gmra.mrb[0].mxu0 %v951_v32 }
 0x1e0   : > { %v1034_v20 = vpop.permute.xlu0 %1033 }
 0x297   : > { %v1070_v33 = vpop.f32.mrb[0].mxu0 }
 0x298   : > { %v1071_v34 = vadd.f32 %v1070_v33, %v1034_v20  ;;  %v1354_v35 = vpop.f32.mrb[1].mxu0 }
 0x299   : > { %v1073_v36 = vpop.f32.mrb[2].mxu0 }
 0x29a   : > { %v1209_v37 = vmul.f32 -1.442695, %v1071_v34  ;;  %v1355_v38 = vpop.f32.mrb[3].mxu0 }
 0x29c   : > { %1443 = vpow2.f32 %v1209_v37 }
 0x2a6   : > { %v1444_v27 = vpop.eup %1443 }
 0x2a7   : > { %v1079_v39 = vadd.f32 1.0, %v1444_v27 }
 0x2a9   : > { %1445 = vrcp.f32 %v1079_v39 }
 0x2b3   : > { %v1446_v40 = vpop.eup %1445 }
 0x2b4   : > { %1082 = vst [vmem:[%s1758_s6] sm:$0xff] %v1446_v40 }
 0x2b5 PF: > { %s16_s23 = sadd.s32 1, %s1469_s23   ;;  %s1759_s21 = smov %s1465_s22 }
 0x2b6   : > { %p13_p7 = scmp.ge.s32.totalorder %s16_s23, 4   ;;  %s1760_s22 = smov %s1762_s24 }
 0x2b8   :  { %15 = sbr.rel (!%p13_p7) target bundleno = 2 (0x2), region = 88 }

</bundles_post_ra>
